<compile_context>
chip_gen: v7x
topology: tpu7x:2x2x1
jax: 0.10.0
libtpu: 0.0.40
codegen_flags: <defaults>
</compile_context>

<pallas_src>
import functools
import math

import jax
import jax.numpy as jnp
from jax.experimental import pallas as pl
from jax.experimental.pallas import tpu as pltpu


# -----------------------------------------------------------------------------
# Parameter / buffer setup (plain JAX glue, mirrors nn.Module.__init__)
# -----------------------------------------------------------------------------
def make_positional_encoding(max_len: int, embedding_dim: int,
                             dtype=jnp.float32) -> jnp.ndarray:
    """Builds the pe buffer of shape [max_len, 1, embedding_dim]."""
    position = jnp.arange(0, max_len, dtype=jnp.float32)[:, None]            # [L, 1]
    div_term = jnp.exp(
        jnp.arange(0, embedding_dim, 2, dtype=jnp.float32)
        * (-math.log(10000.0) / embedding_dim)
    )                                                                         # [ceil(D/2)]
    angles = position * div_term                                              # [L, ceil(D/2)]
    pe = jnp.zeros((max_len, embedding_dim), dtype=jnp.float32)
    pe = pe.at[:, 0::2].set(jnp.sin(angles))
    # Truncate for odd embedding_dim so the cos assignment is shape-safe.
    pe = pe.at[:, 1::2].set(jnp.cos(angles[:, : embedding_dim // 2]))
    # unsqueeze(0).transpose(0, 1) -> [max_len, 1, embedding_dim].
    # Cast ONCE here so the per-forward path never converts the full buffer.
    return pe[:, None, :].astype(dtype)


# -----------------------------------------------------------------------------
# Pallas kernel: lane-dense broadcast-add of the positional encoding
# -----------------------------------------------------------------------------
def pe_add_kernel(x_ref, pe_ref, o_ref, *, batch_per_group: int):
    # x_ref / o_ref: [tile_s, batch_per_group * D]    pe_ref: [tile_s, D]
    pe_tile = pe_ref[...]
    d = pe_ref.shape[-1]
    # Unrolled static-sliced adds: no jnp.tile materialization of a block-sized
    # pe copy.  Each slice start is a compile-time multiple of D (D % 128 == 0
    # is guaranteed by the wrapper), so loads/stores stay full-lane, unmasked.
    for b in range(batch_per_group):
        o_ref[:, b * d:(b + 1) * d] = x_ref[:, b * d:(b + 1) * d] + pe_tile
    # TODO(synk): training-mode dropout (nn.Dropout) omitted; eval semantics
    # (identity) are reproduced.  If needed, fuse it here with pltpu.prng_seed +
    # pltpu.prng_random_bits rather than a second HBM pass.


# -----------------------------------------------------------------------------
# Block sizing helpers
# -----------------------------------------------------------------------------
def _sublane_multiple(dtype) -> int:
    """Rows per packed sublane: 8 (f32), 16 (bf16/f16), 32 (int8/fp8)."""
    return max(8, 32 // jnp.dtype(dtype).itemsize)


def _vmem_capacity_bytes() -> int:
    try:
        return int(pltpu.get_tpu_info().vmem_capacity_bytes)
    except Exception:
        return 128 << 20  # conservative v5e/v6e-sized fallback


def _block_budget() -> tuple[int, int]:
    """(target x-block bytes, scoped VMEM limit), generation-aware.

    v7x-class (64 MiB VMEM, ~3.2 TB/s HBM): bigger blocks so the ~0.35 us
    per-grid-step overhead stays <10% of each block's DMA time.
    v5e/v6e (128 MiB VMEM): ~4 MiB blocks are already on the measured roofline
    plateau; the explicit limit matters on v5e (16 MiB default scoped VMEM).
    """
    if _vmem_capacity_bytes() <= (64 << 20):
        return 6 << 20, 44 << 20
    return 4 << 20, 48 << 20


def _choose_tile_s(seq_len: int, row_bytes: int, sublane: int,
                   target_block_bytes: int) -> int:
    """Rows of x per block: ~target bytes, sublane-packing aligned."""
    tile = max(sublane, target_block_bytes // max(row_bytes, 1))
    if tile >= seq_len:
        return seq_len                             # single full-extent block
    return max(sublane, (tile // sublane) * sublane)


# -----------------------------------------------------------------------------
# Wrapper
# -----------------------------------------------------------------------------
def positional_encoding_forward(x: jnp.ndarray, pe: jnp.ndarray,
                                *, tile_s: int | None = None,
                                col_groups: int | None = None) -> jnp.ndarray:
    """x: [S, B, D]; pe: [max_len, 1, D] (or [max_len, D]).
    Returns dropout_eval(x + pe[:S]) == x + pe[:S]."""
    S, B, D = x.shape
    pe2d = pe.reshape(pe.shape[0], pe.shape[-1])
    max_len = pe2d.shape[0]
    assert max_len >= S, "sequence longer than positional-encoding buffer"

    if D % 128 != 0:
        # Narrow / lane-misaligned embedding: the kernel's advantage (unmasked
        # lane-dense stores) is unavailable and the model is tiny; a plain XLA
        # add is at least as fast.
        return x + pe2d[:S].astype(x.dtype)[:, None, :]

    # pe is normally cast once at creation; if a caller hands us a mismatched
    # dtype buffer, convert only the rows the kernel will touch.
    if pe2d.dtype != x.dtype:
        pe2d = pe2d[:S].astype(x.dtype)

    target_block_bytes, vmem_limit = _block_budget()

    # Optional lane-axis split over batch groups: keeps full-size blocks on
    # both v7x TensorCores instead of shrinking tile_s; per-block byte budget
    # is unchanged so it is ~neutral on single-TC generations.
    x_bytes = S * B * D * x.dtype.itemsize
    if col_groups is None:
        col_groups = 2 if (B % 2 == 0
                           and ((B // 2) * D) % 128 == 0
                           and x_bytes >= 4 * target_block_bytes) else 1
    assert B % col_groups == 0
    bpg = B // col_groups
    cols_per_group = bpg * D

    # Lane-dense 2D view (free reshape of contiguous trailing dims).
    x2d = x.reshape(S, B * D)

    sublane = _sublane_multiple(x.dtype)
    row_bytes = cols_per_group * x.dtype.itemsize
    if tile_s is None:
        tile_s = _choose_tile_s(S, row_bytes, sublane, target_block_bytes)
    tile_s = min(tile_s, S)
    grid = (pl.cdiv(S, tile_s), col_groups)

    out2d = pl.pallas_call(
        functools.partial(pe_add_kernel, batch_per_group=bpg),
        out_shape=jax.ShapeDtypeStruct((S, B * D), x.dtype),
        grid_spec=pltpu.PrefetchScalarGridSpec(
            num_scalar_prefetch=0,
            grid=grid,
            in_specs=[
                # Minor block dim is a multiple of 128 (D % 128 == 0); tile_s
                # is either S or a multiple of the dtype's sublane packing.
                pl.BlockSpec((tile_s, cols_per_group), lambda i, j: (i, j)),
                pl.BlockSpec((tile_s, D), lambda i, j: (i, 0)),
            ],
            out_specs=pl.BlockSpec((tile_s, cols_per_group), lambda i, j: (i, j)),
        ),
        # In-place add on x's buffer when the caller donates x.
        input_output_aliases={0: 0},
        compiler_params=pltpu.CompilerParams(
            dimension_semantics=("parallel", "parallel"),
            vmem_limit_bytes=vmem_limit,
        ),
    )(x2d, pe2d)
    return out2d.reshape(S, B, D)


# -----------------------------------------------------------------------------
# Demo / correctness check
# -----------------------------------------------------------------------------
if __name__ == "__main__":
    key = jax.random.PRNGKey(0)
    kx1, kx2 = jax.random.split(key)

    # Main check: lane-aligned embedding exercises the Pallas path and the
    # per-batch unrolled add (B=2 column slabs within one block).
    max_len, embedding_dim, seq_len, batch = 64, 128, 8, 2
    pe = make_positional_encoding(max_len, embedding_dim)          # [64, 1, 128]
    x = jax.random.normal(kx1, (seq_len, batch, embedding_dim), dtype=jnp.float32)
    ref = x + pe[:seq_len]                     # computed before the aliased call
    out = jax.block_until_ready(positional_encoding_forward(x, pe))
    assert out.shape == (seq_len, batch, embedding_dim)
    assert jnp.allclose(out, ref, atol=1e-6), "mismatch vs reference (single block)"

    # Multi-block grid with a partial tail block (S=20, tile_s=8 -> 3 steps),
    # exercising the pe/x block index maps across grid steps.
    seq_len2 = 20
    x2 = jax.random.normal(kx2, (seq_len2, batch, embedding_dim), dtype=jnp.float32)
    ref2 = x2 + pe[:seq_len2]
    out2 = jax.block_until_ready(positional_encoding_forward(x2, pe, tile_s=8))
    assert jnp.allclose(out2, ref2, atol=1e-6), "mismatch vs reference (multi block)"

    print("KERNEL_OK")
</pallas_src>

<mosaic_0001>
module attributes {stable_mosaic.version = 11 : i64} {
  func.func @pe_add_kernel(%arg0: i32, %arg1: i32, %arg2: memref<8x256xf32, #tpu.memory_space<vmem>>, %arg3: memref<8x128xf32, #tpu.memory_space<vmem>>, %arg4: memref<8x256xf32, #tpu.memory_space<vmem>>) attributes {dimension_semantics = [#tpu.dimension_semantics<parallel>, #tpu.dimension_semantics<parallel>], iteration_bounds = array<i64: 1, 1>, scalar_prefetch = 0 : i64, scratch_operands = 0 : i64, tpu.core_type = #tpu.core_type<tc>, window_params = [{transform_indices = @transform_0, window_bounds = array<i64: 8, 256>}, {transform_indices = @transform_1, window_bounds = array<i64: 8, 128>}, {transform_indices = @transform_2, window_bounds = array<i64: 8, 256>}]} {
    %c0 = arith.constant 0 : index
    %c0_0 = arith.constant 0 : index
    %0 = vector.load %arg3[%c0, %c0_0] : memref<8x128xf32, #tpu.memory_space<vmem>>, vector<8x128xf32>
    %c0_1 = arith.constant 0 : index
    %c0_2 = arith.constant 0 : index
    %1 = vector.load %arg2[%c0_1, %c0_2] : memref<8x256xf32, #tpu.memory_space<vmem>>, vector<8x128xf32>
    %2 = arith.addf %1, %0 : vector<8x128xf32>
    %c0_3 = arith.constant 0 : index
    %c0_4 = arith.constant 0 : index
    %3 = vector.load %arg4[%c0_3, %c0_4] : memref<8x256xf32, #tpu.memory_space<vmem>>, vector<8x128xf32>
    tpu.vector_store %arg4[%c0_3, %c0_4], %2 {strides = array<i32>} : memref<8x256xf32, #tpu.memory_space<vmem>>, vector<8x128xf32>,
    %c0_5 = arith.constant 0 : index
    %c128 = arith.constant 128 : index
    %4 = vector.load %arg2[%c0_5, %c128] : memref<8x256xf32, #tpu.memory_space<vmem>>, vector<8x128xf32>
    %5 = arith.addf %4, %0 : vector<8x128xf32>
    %c0_6 = arith.constant 0 : index
    %c128_7 = arith.constant 128 : index
    %6 = vector.load %arg4[%c0_6, %c128_7] : memref<8x256xf32, #tpu.memory_space<vmem>>, vector<8x128xf32>
    tpu.vector_store %arg4[%c0_6, %c128_7], %5 {strides = array<i32>} : memref<8x256xf32, #tpu.memory_space<vmem>>, vector<8x128xf32>,
    return
  }
  func.func @transform_0(%arg0: i32, %arg1: i32) -> (i32, i32) {
    %c0_i32 = arith.constant 0 : i32
    return %arg0, %arg1 : i32, i32
  }
  func.func @transform_1(%arg0: i32, %arg1: i32) -> (i32, i32) {
    %c0_i32 = arith.constant 0 : i32
    %c0_i32_0 = arith.constant 0 : i32
    return %arg0, %c0_i32 : i32, i32
  }
  func.func @transform_2(%arg0: i32, %arg1: i32) -> (i32, i32) {
    %c0_i32 = arith.constant 0 : i32
    return %arg0, %arg1 : i32, i32
  }
}

</mosaic_0001>

<bundles_post_ra>
// kernel: tpu_custom_call.1
= control target key start
LH: loop header
LB: loop body
LE: loop exit
PB: predicated region body
PF: predicated region fallthrough
CT: control target
= control target key end

     0   :  { %7 = vsyncpa [#allocation3], 0  ;;  %s198_s0 = inlined_call_operand.hbm [shape: f32[8,256], index: 0, kind: input, shape index: {}, may-alias: {0,2}]   ;;  %s199_s1 = inlined_call_operand.hbm [shape: f32[64,128], index: 1, kind: input, shape index: {}]   ;;  %s200_s2 = inlined_call_operand.hbm [shape: f32[8,256], index: 2, kind: output, shape index: {}, may-alias: {0,2}]  }
   0x1   :  { %8 = vsyncpa [#allocation6], 0 }
   0x2   :  { %9 = vsyncpa [#allocation4], 0  ;;  %s134_s9 = smov [#allocation2]   ;;  %s135_s11 = smov [#allocation5]  }
   0x3   :  { %s16_s10 = sshll.u32 %s134_s9, 4  ;;  %s26_s12 = sshll.u32 %s135_s11, 4  ;;  %s17_s10 = int_to_ptr.vmem [resolvable:$true] %s16_s10  ;;  %s152_s12 = int_to_ptr.vmem [resolvable:$true] %s26_s12 }
   0x4   :  { %s62_s15 = scalar_lea.hbm %s198_s0, 256 }
   0x5   :  { %p63_p0 = scmp.ne.s32.totalorder %s198_s0, %s62_s15  ;;  %p66_p1 = scmp.lt.u32.totalorder %s62_s15, %s198_s0 }
   0x7   :  { %p68_p2 = pnand %p66_p1, %p63_p0 }
   0x9   :  { %71 = shalt.err (!%p68_p2)
}
   0xa   :  { %s72_s20 = scalar_lea.vmem %s17_s10, 256  ;;  %p77_p4 = scmp.lt.s32.totalorder %s17_s10, %s17_s10 }
   0xb   :  { %p73_p3 = scmp.ne.s32.totalorder %s17_s10, %s72_s20  ;;  %p78_p5 = scmp.lt.s32.totalorder %s72_s20, %s72_s20 }
   0xd   :  { %p79_p6 = por %p78_p5, %p77_p4 }
   0xf   :  { %p80_p7 = pnand %p79_p6, %p73_p3 }
  0x11   :  { %83 = shalt.err (!%p80_p7)
}
  0x12   :  { %19 = dma.hbm_to_vmem [thread:$0]  %s198_s0, 256, %s17_s10, [#allocation3]  }
  0x13   :  { %s84_s25 = scalar_lea.hbm %s199_s1, 128  ;;  %s86_s30 = scalar_lea.hbm %s199_s1, 1024 }
  0x14   :  { %p85_p8 = scmp.ne.s32.totalorder %s199_s1, %s84_s25  ;;  %p87_p9 = scmp.lt.u32.totalorder %s86_s30, %s84_s25 }
  0x15   :  { %p88_p10 = scmp.lt.u32.totalorder %s84_s25, %s199_s1 }
  0x17   :  { %p89_p11 = por %p88_p10, %p87_p9 }
  0x19   :  { %p90_p12 = pnand %p89_p11, %p85_p8 }
  0x1b   :  { %93 = shalt.err (!%p90_p12)
}
  0x1c   :  { %s94_s0 = scalar_lea.vmem %s152_s12, 128  ;;  %p99_p0 = scmp.lt.s32.totalorder %s152_s12, %s152_s12 }
  0x1d   :  { %p95_p13 = scmp.ne.s32.totalorder %s152_s12, %s94_s0  ;;  %p100_p1 = scmp.lt.s32.totalorder %s94_s0, %s94_s0 }
  0x1f   :  { %p101_p2 = por %p100_p1, %p99_p0 }
  0x21   :  { %p102_p3 = pnand %p101_p2, %p95_p13 }
  0x23   :  { %105 = shalt.err (!%p102_p3)
}
  0x24   :  { %29 = dma.hbm_to_vmem [thread:$0]  %s199_s1, 128, %s152_s12, [#allocation6]  }
  0x25   :  { %128 = dma.done.wait [#allocation3], 256  }
  0x26   :  { %129 = vsyncadd [#allocation3], 4294967040 }
  0x27   :  { %130 = dma.done.wait [#allocation6], 128  }
  0x28   :  { %131 = vsyncadd [#allocation6], 4294967168  ;;  %s136_s7 = smov [#allocation7]   ;;  %v36_v0 = vld [vmem:[#allocation5] sm:$0xff]  ;;  %v37_v1 = vld [vmem:[#allocation2] sm:$0xff] }
  0x29   :  { %s49_s8 = sshll.u32 %s136_s7, 4  ;;  %v40_v2 = vld [vmem:[#allocation2 + $0x8] sm:$0xff]  ;;  %v38_v3 = vadd.f32 %v37_v1, %v36_v0  ;;  %s50_s8 = int_to_ptr.vmem [resolvable:$true] %s49_s8 }
  0x2a   :  { %v41_v4 = vadd.f32 %v40_v2, %v36_v0  ;;  %s106_s9 = scalar_lea.vmem %s50_s8, 256  ;;  %p111_p5 = scmp.lt.s32.totalorder %s50_s8, %s50_s8 }
  0x2b   :  { %39 = vst [vmem:[#allocation7] sm:$0xff] %v38_v3  ;;  %p107_p4 = scmp.ne.s32.totalorder %s50_s8, %s106_s9  ;;  %p112_p6 = scmp.lt.s32.totalorder %s106_s9, %s106_s9 }
  0x2c   :  { %42 = vst [vmem:[#allocation7 + $0x8] sm:$0xff] %v41_v4 }
  0x2d   :  { %p113_p7 = por %p112_p6, %p111_p5 }
  0x2f   :  { %p114_p8 = pnand %p113_p7, %p107_p4 }
  0x31   :  { %117 = shalt.err (!%p114_p8)
}
  0x32   :  { %s118_s11 = scalar_lea.hbm %s200_s2, 256 }
  0x33   :  { %p119_p9 = scmp.ne.s32.totalorder %s200_s2, %s118_s11  ;;  %p122_p10 = scmp.lt.u32.totalorder %s118_s11, %s200_s2 }
  0x35   :  { %p124_p11 = pnand %p122_p10, %p119_p9 }
  0x37   :  { %127 = shalt.err (!%p124_p11)
}
  0x38   :  { %52 = dma.vmem_to_hbm [thread:$0]  %s50_s8, 256, %s200_s2, [#allocation4]  }
  0x39   :  { %132 = dma.done.wait [#allocation4], 256  }
  0x3a   :  { %133 = vsyncadd [#allocation4], 4294967040 }
  0x3b   :  { %56 = vsyncpa [#allocation3], 1 }
  0x3c   :  { %57 = vsyncpa [#allocation6], 1 }
  0x3d   :  { %58 = vsyncpa [#allocation4], 1 }

</bundles_post_ra>
